<compile_context>
chip_gen: v7x
topology: tpu7x:2x2x1
jax: 0.10.0
libtpu: 0.0.40
codegen_flags: <defaults>
</compile_context>

<pallas_src>
import math
import functools

import jax
import jax.numpy as jnp
from jax import lax
from jax.experimental import pallas as pl
from jax.experimental.pallas import tpu as pltpu

EPS = 1e-8


def _modconv_kernel(style_ref, mod_w_ref, mod_b_ref, w_ref, x_ref, o_ref, w_cache,
                    *, k, demodulate):
    """Grid = (batch b, row-tile t).

    style_ref : (1, 1, style_dim)               per-sample style vector
    mod_w_ref : (C_in, style_dim)               EqualLinear weight (prescaled)
    mod_b_ref : (C_in, 1)                       EqualLinear bias
    w_ref     : (kk, C_in, C_out)               conv_scale * weight * demod (batch-invariant)
    x_ref     : (1, 1, h_tile+2p, W+2p, C_in)   zero-padded NHWC row window (halo'd)
    o_ref     : (1, h_tile, W, C_out)           output tile (C_out lane-dense)
    w_cache   : VMEM (kk, C_in, C_out)          per-sample modulated weight cache
    """
    h_tile = o_ref.shape[1]
    out_w = o_ref.shape[2]
    c_out = o_ref.shape[3]
    t = pl.program_id(1)

    # ---- per-sample modulated weight, computed once per b (t axis is "arbitrary") ----
    @pl.when(t == 0)
    def _refresh_weight_cache():
        # EqualLinear(style_dim -> C_in), bias_init = 1: s = W_mod @ style + b
        s = jnp.sum(mod_w_ref[...] * style_ref[0], axis=1, keepdims=True)   # (C_in, 1)
        s = s + mod_b_ref[...]
        if demodulate:
            # new_demodulation: normalize style across in_channel
            s = s * lax.rsqrt(jnp.mean(s * s, axis=0, keepdims=True) + EPS)
        # fold the per-sample per-C_in scale into the (already demodulated) weight
        w_cache[...] = (w_ref[...] * s[None]).astype(w_cache.dtype)

    # ---- conv as k*k shifted matmuls per output row, chained into one f32 acc ----
    def row_body(y, carry):
        rows = x_ref[0, 0, pl.ds(y, k), :, :]                 # (k, W+2p, C_in)
        acc = jnp.zeros((out_w, c_out), jnp.float32)
        for ky in range(k):
            row = rows[ky]                                    # (W+2p, C_in)
            for kx in range(k):
                acc = acc + jnp.dot(row[kx:kx + out_w],       # (W, C_in)
                                    w_cache[ky * k + kx],     # (C_in, C_out)
                                    preferred_element_type=jnp.float32)
        o_ref[0, pl.ds(y, 1), :, :] = acc[None].astype(o_ref.dtype)
        return carry

    lax.fori_loop(0, h_tile, row_body, 0)


def _vmem_capacity_bytes(default=64 * 1024 * 1024):
    """Best-effort VMEM capacity query; conservative 64 MiB fallback (valid on v7x)."""
    try:
        info = pltpu.get_tpu_info()
        for attr in ("vmem_capacity_bytes", "vmem_size_bytes", "vmem_bytes"):
            v = getattr(info, attr, None)
            if v:
                return int(v)
    except Exception:
        pass
    return default


def _pick_h_tile(H, p, in_row_bytes, out_row_bytes, fixed_bytes, budget):
    """Largest row tile dividing H (multiple of 8, or H itself) that fits the budget."""
    cands = sorted({d for d in range(8, H + 1, 8) if H % d == 0} | {H}, reverse=True)
    for h in cands:
        need = fixed_bytes + 2 * (h + 2 * p) * in_row_bytes + 2 * h * out_row_bytes
        if need <= budget:
            return h
    # TODO(synk): pad H / mask the tail tile when no clean divisor fits the budget.
    return cands[-1]


def modulated_conv2d(x, style, weight, mod_weight, mod_bias, kernel_size,
                     demodulate=True, compute_dtype=jnp.bfloat16,
                     out_dtype=jnp.float32, h_tile=None):
    """Pallas forward of ModulatedConv2d for 2-D style input (new_demodulation path)."""
    B, C_in, H, W = x.shape
    _, C_out, _, k, _ = weight.shape
    assert k == kernel_size
    p = k // 2
    kk = k * k
    style_dim = style.shape[1]
    conv_scale = 1.0 / math.sqrt(C_in * k * k)     # self.scale
    mod_scale = 1.0 / math.sqrt(style_dim)         # EqualLinear scale (lr_mul = 1)

    # ---- batch-invariant weight prep (hoisted out of the grid) ----
    w = (conv_scale * weight[0]).astype(jnp.float32)                       # (C_out, C_in, k, k)
    if demodulate:
        w = w * lax.rsqrt(jnp.sum(w * w, axis=(1, 2, 3), keepdims=True) + EPS)
    # (ky, kx, C_in, C_out): per-tap (C_in, C_out) matmul RHS, tap index = ky*k + kx
    w_kk = jnp.transpose(w, (2, 3, 1, 0)).reshape(kk, C_in, C_out)

    # TODO(synk): for the first layer (C_in=3) pad C_in to a sublane/lane multiple.
    mod_w = (mod_weight * mod_scale).astype(jnp.float32)                   # (C_in, style_dim)
    mod_b = mod_bias.reshape(C_in, 1).astype(jnp.float32)                  # (C_in, 1)
    style_in = style.reshape(B, 1, style_dim).astype(jnp.float32)          # (B, 1, style_dim)

    # ---- activations: zero-padded NHWC (no k*k im2col blow-up) ----
    x_nhwc = jnp.transpose(x, (0, 2, 3, 1)).astype(compute_dtype)          # (B, H, W, C_in)
    xpad = jnp.pad(x_nhwc, ((0, 0), (p, p), (p, p), (0, 0)))               # (B, H+2p, W+2p, C_in)
    W_pad = W + 2 * p

    # ---- generation-aware tile / VMEM budgeting ----
    vmem_cap = _vmem_capacity_bytes()
    cdt = jnp.dtype(compute_dtype).itemsize
    odt = jnp.dtype(out_dtype).itemsize
    in_row = W_pad * C_in * cdt
    out_row = W * C_out * odt
    fixed = (2 * kk * C_in * C_out * 4                 # conv weight (worst case 2x buffered)
             + kk * C_in * C_out * cdt                 # modulated-weight VMEM cache
             + 2 * (C_in * style_dim + C_in + style_dim) * 4
             + (1 << 16))
    if h_tile is None:
        h_tile = _pick_h_tile(H, p, in_row, out_row, fixed, int(0.65 * vmem_cap))
    assert H % h_tile == 0, "h_tile must divide H"
    n_h = H // h_tile
    rows_blk = h_tile + 2 * p
    need = fixed + 2 * rows_blk * in_row + 2 * h_tile * out_row
    vmem_limit = int(min(0.9 * vmem_cap, max(32 * 1024 * 1024, 1.4 * need)))

    if n_h == 1:
        x_win = xpad[:, None]                                              # (B, 1, H+2p, W+2p, C_in)
    else:
        # TODO(synk): replace these overlapping row windows with a halo'd pl.Element
        # index_map (or pl.ANY + make_async_copy) so the 2p halo rows are not
        # re-materialized in HBM.
        x_win = jnp.stack(
            [lax.slice_in_dim(xpad, t * h_tile, t * h_tile + rows_blk, axis=1)
             for t in range(n_h)], axis=1)                                 # (B, n_h, rows_blk, W_pad, C_in)

    kernel = functools.partial(_modconv_kernel, k=k, demodulate=demodulate)

    def run(single_buffer_weights):
        const = {}
        if single_buffer_weights:
            # grid-invariant operands: no need for double buffering
            const = dict(pipeline_mode=pl.Buffered(1))
        in_specs = [
            pl.BlockSpec((1, 1, style_dim), lambda b, t: (b, 0, 0)),
            pl.BlockSpec((C_in, style_dim), lambda b, t: (0, 0), **const),
            pl.BlockSpec((C_in, 1), lambda b, t: (0, 0), **const),
            pl.BlockSpec((kk, C_in, C_out), lambda b, t: (0, 0, 0), **const),
            pl.BlockSpec((1, 1, rows_blk, W_pad, C_in), lambda b, t: (b, t, 0, 0, 0)),
        ]
        return pl.pallas_call(
            kernel,
            out_shape=jax.ShapeDtypeStruct((B, H, W, C_out), out_dtype),
            grid=(B, n_h),
            in_specs=in_specs,
            out_specs=pl.BlockSpec((1, h_tile, W, C_out), lambda b, t: (b, t, 0, 0)),
            scratch_shapes=[pltpu.VMEM((kk, C_in, C_out), compute_dtype)],
            compiler_params=pltpu.CompilerParams(
                # t must be "arbitrary": the per-b weight cache is refreshed at t == 0.
                dimension_semantics=("parallel", "arbitrary"),
                vmem_limit_bytes=vmem_limit),
        )(style_in, mod_w, mod_b, w_kk, x_win)

    try:
        out_nhwc = jax.block_until_ready(run(True))
    except Exception:
        # pipeline_mode=pl.Buffered(1) not supported by this JAX/Mosaic build.
        out_nhwc = run(False)

    return jnp.transpose(out_nhwc, (0, 3, 1, 2))                            # (B, C_out, H, W)


def reference_modulated_conv2d(x, style, weight, mod_weight, mod_bias, kernel_size,
                               demodulate=True):
    """Pure-JAX reference mirroring the PyTorch forward (2-D style path)."""
    B, C_in, H, W = x.shape
    k = kernel_size
    p = k // 2
    mod_scale = 1.0 / math.sqrt(style.shape[1])
    conv_scale = 1.0 / math.sqrt(C_in * k * k)

    s = style @ (mod_weight * mod_scale).T + mod_bias[None, :]             # (B, C_in)
    if demodulate:
        s = s * lax.rsqrt(jnp.mean(s * s, axis=1, keepdims=True) + EPS)
    x_mod = x * s[:, :, None, None]

    w = conv_scale * weight[0]                                             # (C_out, C_in, k, k)
    if demodulate:
        demod = lax.rsqrt(jnp.sum(w * w, axis=(1, 2, 3)) + EPS)
        w = w * demod[:, None, None, None]

    return lax.conv_general_dilated(x_mod, w, window_strides=(1, 1),
                                    padding=[(p, p), (p, p)],
                                    dimension_numbers=("NCHW", "OIHW", "NCHW"))


if __name__ == "__main__":
    B, C_in, C_out, ksize, style_dim, H, W = 2, 4, 8, 3, 8, 16, 16

    key = jax.random.PRNGKey(0)
    kw, km, kx_, ks_ = jax.random.split(key, 4)

    weight = jax.random.normal(kw, (1, C_out, C_in, ksize, ksize), jnp.float32)
    mod_weight = jax.random.normal(km, (C_in, style_dim), jnp.float32)     # EqualLinear.weight
    mod_bias = jnp.ones((C_in,), jnp.float32)                              # bias_init = 1

    x = jax.random.normal(kx_, (B, C_in, H, W), jnp.float32)
    style = jax.random.normal(ks_, (B, style_dim), jnp.float32)

    ref = reference_modulated_conv2d(x, style, weight, mod_weight, mod_bias, ksize)

    # f32 MXU operands: tight tolerance vs the f32 reference
    out_f32 = modulated_conv2d(x, style, weight, mod_weight, mod_bias, ksize,
                               compute_dtype=jnp.float32)
    out_f32 = jax.block_until_ready(out_f32)
    assert out_f32.shape == (B, C_out, H, W)
    assert bool(jnp.allclose(out_f32, ref, atol=1e-4, rtol=1e-4)), "f32 mismatch vs reference"

    # forced row tiling (n_h=2): exercises halo windows + per-b weight-cache reuse
    out_tiled = modulated_conv2d(x, style, weight, mod_weight, mod_bias, ksize,
                                 compute_dtype=jnp.float32, h_tile=8)
    out_tiled = jax.block_until_ready(out_tiled)
    assert bool(jnp.allclose(out_tiled, ref, atol=1e-4, rtol=1e-4)), "tiled mismatch vs reference"

    # bf16 MXU-operand path (default perf mode): f32 accumulation, looser tolerance
    out_bf16 = modulated_conv2d(x, style, weight, mod_weight, mod_bias, ksize,
                                compute_dtype=jnp.bfloat16)
    out_bf16 = jax.block_until_ready(out_bf16)
    assert bool(jnp.allclose(out_bf16, ref, atol=3e-2, rtol=3e-2)), "bf16 mismatch vs reference"

    print("KERNEL_OK")
</pallas_src>

<mosaic_0001>
module attributes {stable_mosaic.version = 11 : i64} {
  func.func @_modconv_kernel(%arg0: i32, %arg1: i32, %arg2: memref<1x1x8xf32, #tpu.memory_space<vmem>>, %arg3: memref<4x8xf32, #tpu.memory_space<vmem>>, %arg4: memref<4x1xf32, #tpu.memory_space<vmem>>, %arg5: memref<9x4x8xf32, #tpu.memory_space<vmem>>, %arg6: memref<1x1x18x18x4xf32, #tpu.memory_space<vmem>>, %arg7: memref<1x16x16x8xf32, #tpu.memory_space<vmem>>, %arg8: memref<9x4x8xf32, #tpu.memory_space<vmem>>) attributes {dimension_semantics = [#tpu.dimension_semantics<parallel>, #tpu.dimension_semantics<arbitrary>], iteration_bounds = array<i64: 2, 1>, scalar_prefetch = 0 : i64, scratch_operands = 1 : i64, tpu.core_type = #tpu.core_type<tc>, window_params = [{transform_indices = @transform_0, window_bounds = array<i64: 1, 1, 8>}, {pipeline_mode = #tpu.pipeline_mode<synchronous>, transform_indices = @transform_1, window_bounds = array<i64: 4, 8>}, {pipeline_mode = #tpu.pipeline_mode<synchronous>, transform_indices = @transform_2, window_bounds = array<i64: 4, 1>}, {pipeline_mode = #tpu.pipeline_mode<synchronous>, transform_indices = @transform_3, window_bounds = array<i64: 9, 4, 8>}, {transform_indices = @transform_4, window_bounds = array<i64: 1, 1, 18, 18, 4>}, {transform_indices = @transform_5, window_bounds = array<i64: 1, 16, 16, 8>}]} {
    %c0_i32 = arith.constant 0 : i32
    %0 = arith.cmpi eq, %arg1, %c0_i32 : i32
    %1 = arith.extui %0 : i1 to i32
    %c0_i32_0 = arith.constant 0 : i32
    %2 = arith.cmpi ne, %1, %c0_i32_0 : i32
    scf.if %2 {
      %c0 = arith.constant 0 : index
      %c0_3 = arith.constant 0 : index
      %4 = vector.load %arg3[%c0, %c0_3] : memref<4x8xf32, #tpu.memory_space<vmem>>, vector<4x8xf32>
      %c0_4 = arith.constant 0 : index
      %c0_5 = arith.constant 0 : index
      %c0_6 = arith.constant 0 : index
      %5 = vector.load %arg2[%c0_4, %c0_5, %c0_6] : memref<1x1x8xf32, #tpu.memory_space<vmem>>, vector<1x1x8xf32>
      %6 = vector.shape_cast %5 : vector<1x1x8xf32> to vector<1x8xf32>
      %7 = vector.broadcast %6 : vector<1x8xf32> to vector<4x8xf32>
      %8 = arith.mulf %4, %7 : vector<4x8xf32>
      %cst = arith.constant dense<0.000000e+00> : vector<4xf32>
      %9 = vector.multi_reduction <add>, %8, %cst [1] : vector<4x8xf32> to vector<4xf32>
      %10 = vector.shape_cast %9 : vector<4xf32> to vector<4x1xf32>
      %c0_7 = arith.constant 0 : index
      %c0_8 = arith.constant 0 : index
      %11 = vector.load %arg4[%c0_7, %c0_8] : memref<4x1xf32, #tpu.memory_space<vmem>>, vector<4x1xf32>
      %12 = arith.addf %10, %11 : vector<4x1xf32>
      %13 = arith.mulf %12, %12 : vector<4x1xf32>
      %cst_9 = arith.constant dense<0.000000e+00> : vector<1xf32>
      %14 = vector.multi_reduction <add>, %13, %cst_9 [0] : vector<4x1xf32> to vector<1xf32>
      %15 = vector.shape_cast %14 : vector<1xf32> to vector<1x1xf32>
      %cst_10 = arith.constant 4.000000e+00 : f32
      %16 = vector.broadcast %cst_10 : f32 to vector<1x1xf32>
      %17 = arith.divf %15, %16 : vector<1x1xf32>
      %cst_11 = arith.constant 9.99999993E-9 : f32
      %18 = vector.broadcast %cst_11 : f32 to vector<1x1xf32>
      %19 = arith.addf %17, %18 : vector<1x1xf32>
      %20 = math.rsqrt %19 : vector<1x1xf32>
      %21 = vector.broadcast %20 : vector<1x1xf32> to vector<4x1xf32>
      %22 = arith.mulf %12, %21 : vector<4x1xf32>
      %c0_12 = arith.constant 0 : index
      %c0_13 = arith.constant 0 : index
      %c0_14 = arith.constant 0 : index
      %23 = vector.load %arg5[%c0_12, %c0_13, %c0_14] : memref<9x4x8xf32, #tpu.memory_space<vmem>>, vector<9x4x8xf32>
      %24 = vector.shape_cast %22 : vector<4x1xf32> to vector<1x4x1xf32>
      %25 = vector.broadcast %24 : vector<1x4x1xf32> to vector<9x4x8xf32>
      %26 = arith.mulf %23, %25 : vector<9x4x8xf32>
      %c0_15 = arith.constant 0 : index
      %c0_16 = arith.constant 0 : index
      %c0_17 = arith.constant 0 : index
      %27 = vector.load %arg8[%c0_15, %c0_16, %c0_17] : memref<9x4x8xf32, #tpu.memory_space<vmem>>, vector<9x4x8xf32>
      tpu.vector_store %arg8[%c0_15, %c0_16, %c0_17], %26 {strides = array<i32>} : memref<9x4x8xf32, #tpu.memory_space<vmem>>, vector<9x4x8xf32>,
    } else {
    }
    %c0_i32_1 = arith.constant 0 : i32
    %c16_i32 = arith.constant 16 : i32
    %3 = arith.addi %c0_i32_1, %c16_i32 : i32
    %c1_i32 = arith.constant 1 : i32
    scf.for %arg9 = %c0_i32_1 to %3 step %c1_i32  : i32 {
      %c0 = arith.constant 0 : index
      %c0_3 = arith.constant 0 : index
      %4 = arith.index_cast %arg9 : i32 to index
      %c0_4 = arith.constant 0 : index
      %c0_5 = arith.constant 0 : index
      %5 = vector.load %arg6[%c0, %c0_3, %4, %c0_4, %c0_5] : memref<1x1x18x18x4xf32, #tpu.memory_space<vmem>>, vector<1x1x3x18x4xf32>
      %6 = vector.shape_cast %5 : vector<1x1x3x18x4xf32> to vector<3x18x4xf32>
      %cst = arith.constant 0.000000e+00 : f32
      %7 = vector.broadcast %cst : f32 to vector<16x8xf32>
      %8 = vector.extract_strided_slice %6 {offsets = [0, 0, 0], sizes = [1, 18, 4], strides = [1, 1, 1]} : vector<3x18x4xf32> to vector<1x18x4xf32>
      %9 = vector.shape_cast %8 : vector<1x18x4xf32> to vector<18x4xf32>
      %10 = vector.extract_strided_slice %9 {offsets = [0, 0], sizes = [16, 4], strides = [1, 1]} : vector<18x4xf32> to vector<16x4xf32>
      %c0_6 = arith.constant 0 : index
      %c0_7 = arith.constant 0 : index
      %c0_8 = arith.constant 0 : index
      %11 = vector.load %arg8[%c0_6, %c0_7, %c0_8] : memref<9x4x8xf32, #tpu.memory_space<vmem>>, vector<1x4x8xf32>
      %12 = vector.shape_cast %11 : vector<1x4x8xf32> to vector<4x8xf32>
      %cst_9 = arith.constant dense<0.000000e+00> : vector<16x8xf32>
      %13 = tpu.matmul %10, %12, %cst_9 {dimension_numbers = #tpu.dot_dimension_numbers<[1], [0], [0], [1], [0, 0, 1, 1], [], []>} : vector<16x4xf32>, vector<4x8xf32>, vector<16x8xf32> -> vector<16x8xf32>
      %14 = arith.addf %7, %13 : vector<16x8xf32>
      %15 = vector.extract_strided_slice %9 {offsets = [1, 0], sizes = [16, 4], strides = [1, 1]} : vector<18x4xf32> to vector<16x4xf32>
      %c1 = arith.constant 1 : index
      %c0_10 = arith.constant 0 : index
      %c0_11 = arith.constant 0 : index
      %16 = vector.load %arg8[%c1, %c0_10, %c0_11] : memref<9x4x8xf32, #tpu.memory_space<vmem>>, vector<1x4x8xf32>
      %17 = vector.shape_cast %16 : vector<1x4x8xf32> to vector<4x8xf32>
      %cst_12 = arith.constant dense<0.000000e+00> : vector<16x8xf32>
      %18 = tpu.matmul %15, %17, %cst_12 {dimension_numbers = #tpu.dot_dimension_numbers<[1], [0], [0], [1], [0, 0, 1, 1], [], []>} : vector<16x4xf32>, vector<4x8xf32>, vector<16x8xf32> -> vector<16x8xf32>
      %19 = arith.addf %14, %18 : vector<16x8xf32>
      %20 = vector.extract_strided_slice %9 {offsets = [2, 0], sizes = [16, 4], strides = [1, 1]} : vector<18x4xf32> to vector<16x4xf32>
      %c2 = arith.constant 2 : index
      %c0_13 = arith.constant 0 : index
      %c0_14 = arith.constant 0 : index
      %21 = vector.load %arg8[%c2, %c0_13, %c0_14] : memref<9x4x8xf32, #tpu.memory_space<vmem>>, vector<1x4x8xf32>
      %22 = vector.shape_cast %21 : vector<1x4x8xf32> to vector<4x8xf32>
      %cst_15 = arith.constant dense<0.000000e+00> : vector<16x8xf32>
      %23 = tpu.matmul %20, %22, %cst_15 {dimension_numbers = #tpu.dot_dimension_numbers<[1], [0], [0], [1], [0, 0, 1, 1], [], []>} : vector<16x4xf32>, vector<4x8xf32>, vector<16x8xf32> -> vector<16x8xf32>
      %24 = arith.addf %19, %23 : vector<16x8xf32>
      %25 = vector.extract_strided_slice %6 {offsets = [1, 0, 0], sizes = [1, 18, 4], strides = [1, 1, 1]} : vector<3x18x4xf32> to vector<1x18x4xf32>
      %26 = vector.shape_cast %25 : vector<1x18x4xf32> to vector<18x4xf32>
      %27 = vector.extract_strided_slice %26 {offsets = [0, 0], sizes = [16, 4], strides = [1, 1]} : vector<18x4xf32> to vector<16x4xf32>
      %c3 = arith.constant 3 : index
      %c0_16 = arith.constant 0 : index
      %c0_17 = arith.constant 0 : index
      %28 = vector.load %arg8[%c3, %c0_16, %c0_17] : memref<9x4x8xf32, #tpu.memory_space<vmem>>, vector<1x4x8xf32>
      %29 = vector.shape_cast %28 : vector<1x4x8xf32> to vector<4x8xf32>
      %cst_18 = arith.constant dense<0.000000e+00> : vector<16x8xf32>
      %30 = tpu.matmul %27, %29, %cst_18 {dimension_numbers = #tpu.dot_dimension_numbers<[1], [0], [0], [1], [0, 0, 1, 1], [], []>} : vector<16x4xf32>, vector<4x8xf32>, vector<16x8xf32> -> vector<16x8xf32>
      %31 = arith.addf %24, %30 : vector<16x8xf32>
      %32 = vector.extract_strided_slice %26 {offsets = [1, 0], sizes = [16, 4], strides = [1, 1]} : vector<18x4xf32> to vector<16x4xf32>
      %c4 = arith.constant 4 : index
      %c0_19 = arith.constant 0 : index
      %c0_20 = arith.constant 0 : index
      %33 = vector.load %arg8[%c4, %c0_19, %c0_20] : memref<9x4x8xf32, #tpu.memory_space<vmem>>, vector<1x4x8xf32>
      %34 = vector.shape_cast %33 : vector<1x4x8xf32> to vector<4x8xf32>
      %cst_21 = arith.constant dense<0.000000e+00> : vector<16x8xf32>
      %35 = tpu.matmul %32, %34, %cst_21 {dimension_numbers = #tpu.dot_dimension_numbers<[1], [0], [0], [1], [0, 0, 1, 1], [], []>} : vector<16x4xf32>, vector<4x8xf32>, vector<16x8xf32> -> vector<16x8xf32>
      %36 = arith.addf %31, %35 : vector<16x8xf32>
      %37 = vector.extract_strided_slice %26 {offsets = [2, 0], sizes = [16, 4], strides = [1, 1]} : vector<18x4xf32> to vector<16x4xf32>
      %c5 = arith.constant 5 : index
      %c0_22 = arith.constant 0 : index
      %c0_23 = arith.constant 0 : index
      %38 = vector.load %arg8[%c5, %c0_22, %c0_23] : memref<9x4x8xf32, #tpu.memory_space<vmem>>, vector<1x4x8xf32>
      %39 = vector.shape_cast %38 : vector<1x4x8xf32> to vector<4x8xf32>
      %cst_24 = arith.constant dense<0.000000e+00> : vector<16x8xf32>
      %40 = tpu.matmul %37, %39, %cst_24 {dimension_numbers = #tpu.dot_dimension_numbers<[1], [0], [0], [1], [0, 0, 1, 1], [], []>} : vector<16x4xf32>, vector<4x8xf32>, vector<16x8xf32> -> vector<16x8xf32>
      %41 = arith.addf %36, %40 : vector<16x8xf32>
      %42 = vector.extract_strided_slice %6 {offsets = [2, 0, 0], sizes = [1, 18, 4], strides = [1, 1, 1]} : vector<3x18x4xf32> to vector<1x18x4xf32>
      %43 = vector.shape_cast %42 : vector<1x18x4xf32> to vector<18x4xf32>
      %44 = vector.extract_strided_slice %43 {offsets = [0, 0], sizes = [16, 4], strides = [1, 1]} : vector<18x4xf32> to vector<16x4xf32>
      %c6 = arith.constant 6 : index
      %c0_25 = arith.constant 0 : index
      %c0_26 = arith.constant 0 : index
      %45 = vector.load %arg8[%c6, %c0_25, %c0_26] : memref<9x4x8xf32, #tpu.memory_space<vmem>>, vector<1x4x8xf32>
      %46 = vector.shape_cast %45 : vector<1x4x8xf32> to vector<4x8xf32>
      %cst_27 = arith.constant dense<0.000000e+00> : vector<16x8xf32>
      %47 = tpu.matmul %44, %46, %cst_27 {dimension_numbers = #tpu.dot_dimension_numbers<[1], [0], [0], [1], [0, 0, 1, 1], [], []>} : vector<16x4xf32>, vector<4x8xf32>, vector<16x8xf32> -> vector<16x8xf32>
      %48 = arith.addf %41, %47 : vector<16x8xf32>
      %49 = vector.extract_strided_slice %43 {offsets = [1, 0], sizes = [16, 4], strides = [1, 1]} : vector<18x4xf32> to vector<16x4xf32>
      %c7 = arith.constant 7 : index
      %c0_28 = arith.constant 0 : index
      %c0_29 = arith.constant 0 : index
      %50 = vector.load %arg8[%c7, %c0_28, %c0_29] : memref<9x4x8xf32, #tpu.memory_space<vmem>>, vector<1x4x8xf32>
      %51 = vector.shape_cast %50 : vector<1x4x8xf32> to vector<4x8xf32>
      %cst_30 = arith.constant dense<0.000000e+00> : vector<16x8xf32>
      %52 = tpu.matmul %49, %51, %cst_30 {dimension_numbers = #tpu.dot_dimension_numbers<[1], [0], [0], [1], [0, 0, 1, 1], [], []>} : vector<16x4xf32>, vector<4x8xf32>, vector<16x8xf32> -> vector<16x8xf32>
      %53 = arith.addf %48, %52 : vector<16x8xf32>
      %54 = vector.extract_strided_slice %43 {offsets = [2, 0], sizes = [16, 4], strides = [1, 1]} : vector<18x4xf32> to vector<16x4xf32>
      %c8 = arith.constant 8 : index
      %c0_31 = arith.constant 0 : index
      %c0_32 = arith.constant 0 : index
      %55 = vector.load %arg8[%c8, %c0_31, %c0_32] : memref<9x4x8xf32, #tpu.memory_space<vmem>>, vector<1x4x8xf32>
      %56 = vector.shape_cast %55 : vector<1x4x8xf32> to vector<4x8xf32>
      %cst_33 = arith.constant dense<0.000000e+00> : vector<16x8xf32>
      %57 = tpu.matmul %54, %56, %cst_33 {dimension_numbers = #tpu.dot_dimension_numbers<[1], [0], [0], [1], [0, 0, 1, 1], [], []>} : vector<16x4xf32>, vector<4x8xf32>, vector<16x8xf32> -> vector<16x8xf32>
      %58 = arith.addf %53, %57 : vector<16x8xf32>
      %59 = vector.shape_cast %58 : vector<16x8xf32> to vector<1x16x8xf32>
      %c0_34 = arith.constant 0 : index
      %60 = arith.index_cast %arg9 : i32 to index
      %c0_35 = arith.constant 0 : index
      %c0_36 = arith.constant 0 : index
      %61 = vector.load %arg7[%c0_34, %60, %c0_35, %c0_36] : memref<1x16x16x8xf32, #tpu.memory_space<vmem>>, vector<1x1x16x8xf32>
      %62 = vector.shape_cast %61 : vector<1x1x16x8xf32> to vector<1x16x8xf32>
      %63 = vector.shape_cast %59 : vector<1x16x8xf32> to vector<1x1x16x8xf32>
      tpu.vector_store %arg7[%c0_34, %60, %c0_35, %c0_36], %63 {strides = array<i32>} : memref<1x16x16x8xf32, #tpu.memory_space<vmem>>, vector<1x1x16x8xf32>,
    }
    %c16_i32_2 = arith.constant 16 : i32
    return
  }
  func.func @transform_0(%arg0: i32, %arg1: i32) -> (i32, i32, i32) {
    %c0_i32 = arith.constant 0 : i32
    %c0_i32_0 = arith.constant 0 : i32
    %c0_i32_1 = arith.constant 0 : i32
    return %arg0, %c0_i32, %c0_i32_0 : i32, i32, i32
  }
  func.func @transform_1(%arg0: i32, %arg1: i32) -> (i32, i32) {
    %c0_i32 = arith.constant 0 : i32
    %c0_i32_0 = arith.constant 0 : i32
    %c0_i32_1 = arith.constant 0 : i32
    return %c0_i32, %c0_i32_0 : i32, i32
  }
  func.func @transform_2(%arg0: i32, %arg1: i32) -> (i32, i32) {
    %c0_i32 = arith.constant 0 : i32
    %c0_i32_0 = arith.constant 0 : i32
    %c0_i32_1 = arith.constant 0 : i32
    return %c0_i32, %c0_i32_0 : i32, i32
  }
  func.func @transform_3(%arg0: i32, %arg1: i32) -> (i32, i32, i32) {
    %c0_i32 = arith.constant 0 : i32
    %c0_i32_0 = arith.constant 0 : i32
    %c0_i32_1 = arith.constant 0 : i32
    %c0_i32_2 = arith.constant 0 : i32
    return %c0_i32, %c0_i32_0, %c0_i32_1 : i32, i32, i32
  }
  func.func @transform_4(%arg0: i32, %arg1: i32) -> (i32, i32, i32, i32, i32) {
    %c0_i32 = arith.constant 0 : i32
    %c0_i32_0 = arith.constant 0 : i32
    %c0_i32_1 = arith.constant 0 : i32
    %c0_i32_2 = arith.constant 0 : i32
    return %arg0, %arg1, %c0_i32, %c0_i32_0, %c0_i32_1 : i32, i32, i32, i32, i32
  }
  func.func @transform_5(%arg0: i32, %arg1: i32) -> (i32, i32, i32, i32) {
    %c0_i32 = arith.constant 0 : i32
    %c0_i32_0 = arith.constant 0 : i32
    %c0_i32_1 = arith.constant 0 : i32
    return %arg0, %arg1, %c0_i32, %c0_i32_0 : i32, i32, i32, i32
  }
}

module attributes {stable_mosaic.version = 11 : i64} {
  func.func @_modconv_kernel(%arg0: i32, %arg1: i32, %arg2: memref<1x1x8xf32, #tpu.memory_space<vmem>>, %arg3: memref<4x8xf32, #tpu.memory_space<vmem>>, %arg4: memref<4x1xf32, #tpu.memory_space<vmem>>, %arg5: memref<9x4x8xf32, #tpu.memory_space<vmem>>, %arg6: memref<1x1x18x18x4xf32, #tpu.memory_space<vmem>>, %arg7: memref<1x16x16x8xf32, #tpu.memory_space<vmem>>, %arg8: memref<9x4x8xf32, #tpu.memory_space<vmem>>) attributes {dimension_semantics = [#tpu.dimension_semantics<parallel>, #tpu.dimension_semantics<arbitrary>], iteration_bounds = array<i64: 2, 1>, scalar_prefetch = 0 : i64, scratch_operands = 1 : i64, tpu.core_type = #tpu.core_type<tc>, window_params = [{transform_indices = @transform_0, window_bounds = array<i64: 1, 1, 8>}, {pipeline_mode = #tpu.pipeline_mode<synchronous>, transform_indices = @transform_1, window_bounds = array<i64: 4, 8>}, {pipeline_mode = #tpu.pipeline_mode<synchronous>, transform_indices = @transform_2, window_bounds = array<i64: 4, 1>}, {pipeline_mode = #tpu.pipeline_mode<synchronous>, transform_indices = @transform_3, window_bounds = array<i64: 9, 4, 8>}, {transform_indices = @transform_4, window_bounds = array<i64: 1, 1, 18, 18, 4>}, {transform_indices = @transform_5, window_bounds = array<i64: 1, 16, 16, 8>}]} {
    %c0_i32 = arith.constant 0 : i32
    %0 = arith.cmpi eq, %arg1, %c0_i32 : i32
    %1 = arith.extui %0 : i1 to i32
    %c0_i32_0 = arith.constant 0 : i32
    %2 = arith.cmpi ne, %1, %c0_i32_0 : i32
    scf.if %2 {
      %c0 = arith.constant 0 : index
      %c0_3 = arith.constant 0 : index
      %4 = vector.load %arg3[%c0, %c0_3] : memref<4x8xf32, #tpu.memory_space<vmem>>, vector<4x8xf32>
      %c0_4 = arith.constant 0 : index
      %c0_5 = arith.constant 0 : index
      %c0_6 = arith.constant 0 : index
      %5 = vector.load %arg2[%c0_4, %c0_5, %c0_6] : memref<1x1x8xf32, #tpu.memory_space<vmem>>, vector<1x1x8xf32>
      %6 = vector.shape_cast %5 : vector<1x1x8xf32> to vector<1x8xf32>
      %7 = vector.broadcast %6 : vector<1x8xf32> to vector<4x8xf32>
      %8 = arith.mulf %4, %7 : vector<4x8xf32>
      %cst = arith.constant dense<0.000000e+00> : vector<4xf32>
      %9 = vector.multi_reduction <add>, %8, %cst [1] : vector<4x8xf32> to vector<4xf32>
      %10 = vector.shape_cast %9 : vector<4xf32> to vector<4x1xf32>
      %c0_7 = arith.constant 0 : index
      %c0_8 = arith.constant 0 : index
      %11 = vector.load %arg4[%c0_7, %c0_8] : memref<4x1xf32, #tpu.memory_space<vmem>>, vector<4x1xf32>
      %12 = arith.addf %10, %11 : vector<4x1xf32>
      %13 = arith.mulf %12, %12 : vector<4x1xf32>
      %cst_9 = arith.constant dense<0.000000e+00> : vector<1xf32>
      %14 = vector.multi_reduction <add>, %13, %cst_9 [0] : vector<4x1xf32> to vector<1xf32>
      %15 = vector.shape_cast %14 : vector<1xf32> to vector<1x1xf32>
      %cst_10 = arith.constant 4.000000e+00 : f32
      %16 = vector.broadcast %cst_10 : f32 to vector<1x1xf32>
      %17 = arith.divf %15, %16 : vector<1x1xf32>
      %cst_11 = arith.constant 9.99999993E-9 : f32
      %18 = vector.broadcast %cst_11 : f32 to vector<1x1xf32>
      %19 = arith.addf %17, %18 : vector<1x1xf32>
      %20 = math.rsqrt %19 : vector<1x1xf32>
      %21 = vector.broadcast %20 : vector<1x1xf32> to vector<4x1xf32>
      %22 = arith.mulf %12, %21 : vector<4x1xf32>
      %c0_12 = arith.constant 0 : index
      %c0_13 = arith.constant 0 : index
      %c0_14 = arith.constant 0 : index
      %23 = vector.load %arg5[%c0_12, %c0_13, %c0_14] : memref<9x4x8xf32, #tpu.memory_space<vmem>>, vector<9x4x8xf32>
      %24 = vector.shape_cast %22 : vector<4x1xf32> to vector<1x4x1xf32>
      %25 = vector.broadcast %24 : vector<1x4x1xf32> to vector<9x4x8xf32>
      %26 = arith.mulf %23, %25 : vector<9x4x8xf32>
      %c0_15 = arith.constant 0 : index
      %c0_16 = arith.constant 0 : index
      %c0_17 = arith.constant 0 : index
      %27 = vector.load %arg8[%c0_15, %c0_16, %c0_17] : memref<9x4x8xf32, #tpu.memory_space<vmem>>, vector<9x4x8xf32>
      tpu.vector_store %arg8[%c0_15, %c0_16, %c0_17], %26 {strides = array<i32>} : memref<9x4x8xf32, #tpu.memory_space<vmem>>, vector<9x4x8xf32>,
    } else {
    }
    %c0_i32_1 = arith.constant 0 : i32
    %c16_i32 = arith.constant 16 : i32
    %3 = arith.addi %c0_i32_1, %c16_i32 : i32
    %c1_i32 = arith.constant 1 : i32
    scf.for %arg9 = %c0_i32_1 to %3 step %c1_i32  : i32 {
      %c0 = arith.constant 0 : index
      %c0_3 = arith.constant 0 : index
      %4 = arith.index_cast %arg9 : i32 to index
      %c0_4 = arith.constant 0 : index
      %c0_5 = arith.constant 0 : index
      %5 = vector.load %arg6[%c0, %c0_3, %4, %c0_4, %c0_5] : memref<1x1x18x18x4xf32, #tpu.memory_space<vmem>>, vector<1x1x3x18x4xf32>
      %6 = vector.shape_cast %5 : vector<1x1x3x18x4xf32> to vector<3x18x4xf32>
      %cst = arith.constant 0.000000e+00 : f32
      %7 = vector.broadcast %cst : f32 to vector<16x8xf32>
      %8 = vector.extract_strided_slice %6 {offsets = [0, 0, 0], sizes = [1, 18, 4], strides = [1, 1, 1]} : vector<3x18x4xf32> to vector<1x18x4xf32>
      %9 = vector.shape_cast %8 : vector<1x18x4xf32> to vector<18x4xf32>
      %10 = vector.extract_strided_slice %9 {offsets = [0, 0], sizes = [16, 4], strides = [1, 1]} : vector<18x4xf32> to vector<16x4xf32>
      %c0_6 = arith.constant 0 : index
      %c0_7 = arith.constant 0 : index
      %c0_8 = arith.constant 0 : index
      %11 = vector.load %arg8[%c0_6, %c0_7, %c0_8] : memref<9x4x8xf32, #tpu.memory_space<vmem>>, vector<1x4x8xf32>
      %12 = vector.shape_cast %11 : vector<1x4x8xf32> to vector<4x8xf32>
      %cst_9 = arith.constant dense<0.000000e+00> : vector<16x8xf32>
      %13 = tpu.matmul %10, %12, %cst_9 {dimension_numbers = #tpu.dot_dimension_numbers<[1], [0], [0], [1], [0, 0, 1, 1], [], []>} : vector<16x4xf32>, vector<4x8xf32>, vector<16x8xf32> -> vector<16x8xf32>
      %14 = arith.addf %7, %13 : vector<16x8xf32>
      %15 = vector.extract_strided_slice %9 {offsets = [1, 0], sizes = [16, 4], strides = [1, 1]} : vector<18x4xf32> to vector<16x4xf32>
      %c1 = arith.constant 1 : index
      %c0_10 = arith.constant 0 : index
      %c0_11 = arith.constant 0 : index
      %16 = vector.load %arg8[%c1, %c0_10, %c0_11] : memref<9x4x8xf32, #tpu.memory_space<vmem>>, vector<1x4x8xf32>
      %17 = vector.shape_cast %16 : vector<1x4x8xf32> to vector<4x8xf32>
      %cst_12 = arith.constant dense<0.000000e+00> : vector<16x8xf32>
      %18 = tpu.matmul %15, %17, %cst_12 {dimension_numbers = #tpu.dot_dimension_numbers<[1], [0], [0], [1], [0, 0, 1, 1], [], []>} : vector<16x4xf32>, vector<4x8xf32>, vector<16x8xf32> -> vector<16x8xf32>
      %19 = arith.addf %14, %18 : vector<16x8xf32>
      %20 = vector.extract_strided_slice %9 {offsets = [2, 0], sizes = [16, 4], strides = [1, 1]} : vector<18x4xf32> to vector<16x4xf32>
      %c2 = arith.constant 2 : index
      %c0_13 = arith.constant 0 : index
      %c0_14 = arith.constant 0 : index
      %21 = vector.load %arg8[%c2, %c0_13, %c0_14] : memref<9x4x8xf32, #tpu.memory_space<vmem>>, vector<1x4x8xf32>
      %22 = vector.shape_cast %21 : vector<1x4x8xf32> to vector<4x8xf32>
      %cst_15 = arith.constant dense<0.000000e+00> : vector<16x8xf32>
      %23 = tpu.matmul %20, %22, %cst_15 {dimension_numbers = #tpu.dot_dimension_numbers<[1], [0], [0], [1], [0, 0, 1, 1], [], []>} : vector<16x4xf32>, vector<4x8xf32>, vector<16x8xf32> -> vector<16x8xf32>
      %24 = arith.addf %19, %23 : vector<16x8xf32>
      %25 = vector.extract_strided_slice %6 {offsets = [1, 0, 0], sizes = [1, 18, 4], strides = [1, 1, 1]} : vector<3x18x4xf32> to vector<1x18x4xf32>
      %26 = vector.shape_cast %25 : vector<1x18x4xf32> to vector<18x4xf32>
      %27 = vector.extract_strided_slice %26 {offsets = [0, 0], sizes = [16, 4], strides = [1, 1]} : vector<18x4xf32> to vector<16x4xf32>
      %c3 = arith.constant 3 : index
      %c0_16 = arith.constant 0 : index
      %c0_17 = arith.constant 0 : index
      %28 = vector.load %arg8[%c3, %c0_16, %c0_17] : memref<9x4x8xf32, #tpu.memory_space<vmem>>, vector<1x4x8xf32>
      %29 = vector.shape_cast %28 : vector<1x4x8xf32> to vector<4x8xf32>
      %cst_18 = arith.constant dense<0.000000e+00> : vector<16x8xf32>
      %30 = tpu.matmul %27, %29, %cst_18 {dimension_numbers = #tpu.dot_dimension_numbers<[1], [0], [0], [1], [0, 0, 1, 1], [], []>} : vector<16x4xf32>, vector<4x8xf32>, vector<16x8xf32> -> vector<16x8xf32>
      %31 = arith.addf %24, %30 : vector<16x8xf32>
      %32 = vector.extract_strided_slice %26 {offsets = [1, 0], sizes = [16, 4], strides = [1, 1]} : vector<18x4xf32> to vector<16x4xf32>
      %c4 = arith.constant 4 : index
      %c0_19 = arith.constant 0 : index
      %c0_20 = arith.constant 0 : index
      %33 = vector.load %arg8[%c4, %c0_19, %c0_20] : memref<9x4x8xf32, #tpu.memory_space<vmem>>, vector<1x4x8xf32>
      %34 = vector.shape_cast %33 : vector<1x4x8xf32> to vector<4x8xf32>
      %cst_21 = arith.constant dense<0.000000e+00> : vector<16x8xf32>
      %35 = tpu.matmul %32, %34, %cst_21 {dimension_numbers = #tpu.dot_dimension_numbers<[1], [0], [0], [1], [0, 0, 1, 1], [], []>} : vector<16x4xf32>, vector<4x8xf32>, vector<16x8xf32> -> vector<16x8xf32>
      %36 = arith.addf %31, %35 : vector<16x8xf32>
      %37 = vector.extract_strided_slice %26 {offsets = [2, 0], sizes = [16, 4], strides = [1, 1]} : vector<18x4xf32> to vector<16x4xf32>
      %c5 = arith.constant 5 : index
      %c0_22 = arith.constant 0 : index
      %c0_23 = arith.constant 0 : index
      %38 = vector.load %arg8[%c5, %c0_22, %c0_23] : memref<9x4x8xf32, #tpu.memory_space<vmem>>, vector<1x4x8xf32>
      %39 = vector.shape_cast %38 : vector<1x4x8xf32> to vector<4x8xf32>
      %cst_24 = arith.constant dense<0.000000e+00> : vector<16x8xf32>
      %40 = tpu.matmul %37, %39, %cst_24 {dimension_numbers = #tpu.dot_dimension_numbers<[1], [0], [0], [1], [0, 0, 1, 1], [], []>} : vector<16x4xf32>, vector<4x8xf32>, vector<16x8xf32> -> vector<16x8xf32>
      %41 = arith.addf %36, %40 : vector<16x8xf32>
      %42 = vector.extract_strided_slice %6 {offsets = [2, 0, 0], sizes = [1, 18, 4], strides = [1, 1, 1]} : vector<3x18x4xf32> to vector<1x18x4xf32>
      %43 = vector.shape_cast %42 : vector<1x18x4xf32> to vector<18x4xf32>
      %44 = vector.extract_strided_slice %43 {offsets = [0, 0], sizes = [16, 4], strides = [1, 1]} : vector<18x4xf32> to vector<16x4xf32>
      %c6 = arith.constant 6 : index
      %c0_25 = arith.constant 0 : index
      %c0_26 = arith.constant 0 : index
      %45 = vector.load %arg8[%c6, %c0_25, %c0_26] : memref<9x4x8xf32, #tpu.memory_space<vmem>>, vector<1x4x8xf32>
      %46 = vector.shape_cast %45 : vector<1x4x8xf32> to vector<4x8xf32>
      %cst_27 = arith.constant dense<0.000000e+00> : vector<16x8xf32>
      %47 = tpu.matmul %44, %46, %cst_27 {dimension_numbers = #tpu.dot_dimension_numbers<[1], [0], [0], [1], [0, 0, 1, 1], [], []>} : vector<16x4xf32>, vector<4x8xf32>, vector<16x8xf32> -> vector<16x8xf32>
      %48 = arith.addf %41, %47 : vector<16x8xf32>
      %49 = vector.extract_strided_slice %43 {offsets = [1, 0], sizes = [16, 4], strides = [1, 1]} : vector<18x4xf32> to vector<16x4xf32>
      %c7 = arith.constant 7 : index
      %c0_28 = arith.constant 0 : index
      %c0_29 = arith.constant 0 : index
      %50 = vector.load %arg8[%c7, %c0_28, %c0_29] : memref<9x4x8xf32, #tpu.memory_space<vmem>>, vector<1x4x8xf32>
      %51 = vector.shape_cast %50 : vector<1x4x8xf32> to vector<4x8xf32>
      %cst_30 = arith.constant dense<0.000000e+00> : vector<16x8xf32>
      %52 = tpu.matmul %49, %51, %cst_30 {dimension_numbers = #tpu.dot_dimension_numbers<[1], [0], [0], [1], [0, 0, 1, 1], [], []>} : vector<16x4xf32>, vector<4x8xf32>, vector<16x8xf32> -> vector<16x8xf32>
      %53 = arith.addf %48, %52 : vector<16x8xf32>
      %54 = vector.extract_strided_slice %43 {offsets = [2, 0], sizes = [16, 4], strides = [1, 1]} : vector<18x4xf32> to vector<16x4xf32>
      %c8 = arith.constant 8 : index
      %c0_31 = arith.constant 0 : index
      %c0_32 = arith.constant 0 : index
      %55 = vector.load %arg8[%c8, %c0_31, %c0_32] : memref<9x4x8xf32, #tpu.memory_space<vmem>>, vector<1x4x8xf32>
      %56 = vector.shape_cast %55 : vector<1x4x8xf32> to vector<4x8xf32>
      %cst_33 = arith.constant dense<0.000000e+00> : vector<16x8xf32>
      %57 = tpu.matmul %54, %56, %cst_33 {dimension_numbers = #tpu.dot_dimension_numbers<[1], [0], [0], [1], [0, 0, 1, 1], [], []>} : vector<16x4xf32>, vector<4x8xf32>, vector<16x8xf32> -> vector<16x8xf32>
      %58 = arith.addf %53, %57 : vector<16x8xf32>
      %59 = vector.shape_cast %58 : vector<16x8xf32> to vector<1x16x8xf32>
      %c0_34 = arith.constant 0 : index
      %60 = arith.index_cast %arg9 : i32 to index
      %c0_35 = arith.constant 0 : index
      %c0_36 = arith.constant 0 : index
      %61 = vector.load %arg7[%c0_34, %60, %c0_35, %c0_36] : memref<1x16x16x8xf32, #tpu.memory_space<vmem>>, vector<1x1x16x8xf32>
      %62 = vector.shape_cast %61 : vector<1x1x16x8xf32> to vector<1x16x8xf32>
      %63 = vector.shape_cast %59 : vector<1x16x8xf32> to vector<1x1x16x8xf32>
      tpu.vector_store %arg7[%c0_34, %60, %c0_35, %c0_36], %63 {strides = array<i32>} : memref<1x16x16x8xf32, #tpu.memory_space<vmem>>, vector<1x1x16x8xf32>,
    }
    %c16_i32_2 = arith.constant 16 : i32
    return
  }
  func.func @transform_0(%arg0: i32, %arg1: i32) -> (i32, i32, i32) {
    %c0_i32 = arith.constant 0 : i32
    %c0_i32_0 = arith.constant 0 : i32
    %c0_i32_1 = arith.constant 0 : i32
    return %arg0, %c0_i32, %c0_i32_0 : i32, i32, i32
  }
  func.func @transform_1(%arg0: i32, %arg1: i32) -> (i32, i32) {
    %c0_i32 = arith.constant 0 : i32
    %c0_i32_0 = arith.constant 0 : i32
    %c0_i32_1 = arith.constant 0 : i32
    return %c0_i32, %c0_i32_0 : i32, i32
  }
  func.func @transform_2(%arg0: i32, %arg1: i32) -> (i32, i32) {
    %c0_i32 = arith.constant 0 : i32
    %c0_i32_0 = arith.constant 0 : i32
    %c0_i32_1 = arith.constant 0 : i32
    return %c0_i32, %c0_i32_0 : i32, i32
  }
  func.func @transform_3(%arg0: i32, %arg1: i32) -> (i32, i32, i32) {
    %c0_i32 = arith.constant 0 : i32
    %c0_i32_0 = arith.constant 0 : i32
    %c0_i32_1 = arith.constant 0 : i32
    %c0_i32_2 = arith.constant 0 : i32
    return %c0_i32, %c0_i32_0, %c0_i32_1 : i32, i32, i32
  }
  func.func @transform_4(%arg0: i32, %arg1: i32) -> (i32, i32, i32, i32, i32) {
    %c0_i32 = arith.constant 0 : i32
    %c0_i32_0 = arith.constant 0 : i32
    %c0_i32_1 = arith.constant 0 : i32
    %c0_i32_2 = arith.constant 0 : i32
    return %arg0, %arg1, %c0_i32, %c0_i32_0, %c0_i32_1 : i32, i32, i32, i32, i32
  }
  func.func @transform_5(%arg0: i32, %arg1: i32) -> (i32, i32, i32, i32) {
    %c0_i32 = arith.constant 0 : i32
    %c0_i32_0 = arith.constant 0 : i32
    %c0_i32_1 = arith.constant 0 : i32
    return %arg0, %arg1, %c0_i32, %c0_i32_0 : i32, i32, i32, i32
  }
}

</mosaic_0001>

<bundles_post_ra>
// kernel: tpu_custom_call.1
= control target key start
LH: loop header
LB: loop body
LE: loop exit
PB: predicated region body
PF: predicated region fallthrough
CT: control target
= control target key end

     0   :  { %s1519_s18 = smov 0   ;;  %s1521_s19 = smov 0   ;;  %s1678_s0 = inlined_call_operand.vmem [shape: f32[2,1,8], index: 0, kind: input, shape index: {}]   ;;  %s1679_s1 = inlined_call_operand.vmem [shape: f32[4,8], index: 1, kind: input, shape index: {}]   ;;  %s1680_s2 = inlined_call_operand.vmem [shape: f32[4,1], index: 2, kind: input, shape index: {}]   ;;  %s1681_s3 = inlined_call_operand.vmem [shape: f32[9,4,8], index: 3, kind: input, shape index: {}]   ;;  %s1682_s4 = inlined_call_operand.vmem [shape: f32[2,1,18,18,4], index: 4, kind: input, shape index: {}]   ;;  %s1683_s5 = inlined_call_operand.vmem [shape: f32[2,16,16,8], index: 5, kind: output, shape index: {}]  }
   0x1   :  { %s1523_s20 = smov 0  }
   0x2 LB: > { %s27_s21 = sadd.s32 1, %s1478_s19  ;;  %p1295_p0 = scmp.ge.s32.totalorder %s1482_s20, 1  ;;  %s1482_s20 = sphi %s1523_s20, %s15_s20   ;;  %s1478_s19 = sphi %s1521_s19, %s1685_s19   ;;  %s1474_s18 = sphi %s1519_s18, %s1684_s18  }
   0x3   : > { %p29_p1 = scmp.ge.s32.totalorder %s27_s21, 2  ;;  %p215_p2 = scmp.lt.s32.totalorder %s1482_s20, 3 }
   0x5   : > { %s1687_s21 = smov (%p29_p1, %s27_s21), 0  ;;  %p216_p3 = pnand %p1295_p0, %p215_p2 }
   0x6   : > { %p255_p4 = scmp.lt.s32.totalorder (!%p216_p3), %s1474_s18, 1  ;;  %v282_v0 = vld [vmem:[%s1679_s1] sm:$0xf] (!%p216_p3)  ;;  %vm291_vm0 = vcmask (!%p216_p3), 60416   ;;  %v1488_v4 = vmov (!%p216_p3), 0   ;;  %vm298_vm1 = vcmask (!%p216_p3), 3072  }
   0x7   : > { %219 = sbr.rel (%p216_p3) target bundleno = 589 (0x24d), region = 40  ;;  %1453 = vset.pattern.permute.xlu0 (!%p216_p3), %v1488_v4  ;;  %v295_v5 = vld [vmem:[%s1680_s2] sm:$0xf] (!%p216_p3)  ;;  %v312_v21 = vld [vmem:[%s1681_s3 + $0x4] sm:$0xf] (!%p216_p3)  ;;  %s1593_s10 = smov (!%p216_p3), 0  }
   0x8   : > { %v311_v20 = vld [vmem:[%s1681_s3] sm:$0xf] (!%p216_p3)  ;;  %v313_v22 = vld [vmem:[%s1681_s3 + $0x8] sm:$0xf] (!%p216_p3)  ;;  %v314_v23 = vld [vmem:[%s1681_s3 + $0xc] sm:$0xf] (!%p216_p3) }
   0x9   : > { %v315_v24 = vld [vmem:[%s1681_s3 + $0x10] sm:$0xf] (!%p216_p3)  ;;  %v316_v25 = vld [vmem:[%s1681_s3 + $0x14] sm:$0xf] (!%p216_p3)  ;;  %v317_v26 = vld [vmem:[%s1681_s3 + $0x18] sm:$0xf] (!%p216_p3) }
   0xa   : > { %v318_v27 = vld [vmem:[%s1681_s3 + $0x1c] sm:$0xf] (!%p216_p3)  ;;  %v319_v28 = vld [vmem:[%s1681_s3 + $0x20] sm:$0xf] (!%p216_p3) }
   0xe   : > { %s1689_s18 = smov (!%p255_p4, %s1474_s18), 1 }
   0xf   : > { %s257_s26 = scalar_lea.vmem %s1678_s0, %s1689_s18  ;;  %s1419_s27 = smul.u32 432, %s1689_s18 }
  0x10   : > { %s1330_s28 = sshll.u32 %s1689_s18, 8  ;;  %v1299_v1 = vld [vmem:[%s257_s26] ss:$0 sm:$0xff] }
  0x11   : > { %s1546_s6 = scalar_lea.vmem %s1682_s4, %s1419_s27  ;;  %s1551_s9 = scalar_lea.vmem %s1683_s5, %s1330_s28  ;;  %v290_v2 = vmul.f32 %v1299_v1, %v282_v0 }
  0x13   : > { %v292_v3 = vsel %vm291_vm0, %v290_v2, 0.0 }
  0x14   : > { %293 = vadd.xlane.f32.xlu0 %v292_v3 }
  0xa1   : > { %v294_v6 = vpop.xlane.xlu0 %293 }
  0xa2   : > { %v296_v7 = vadd.f32 %v295_v5, %v294_v6 }
  0xa4   : > { %v297_v8 = vmul.f32 %v296_v7, %v296_v7 }
  0xa6   : > { %v299_v9 = vsel %vm298_vm1, %v297_v8, 0.0 }
  0xa7   : > { %v300_v10 = vrot.slane %v299_v9, 4 }
  0xa9   : > { %v301_v11 = vadd.f32 %v300_v10, %v299_v9 }
  0xab   : > { %v302_v12 = vrot.slane %v301_v11, 2 }
  0xad   : > { %v303_v13 = vadd.f32 %v302_v12, %v301_v11 }
  0xaf   : > { %v304_v14 = vrot.slane %v303_v13, 1 }
  0xb1   : > { %v305_v15 = vadd.f32 %v304_v14, %v303_v13 }
  0xb3   : > { %v307_v16 = vmul.f32 0.25, %v305_v15 }
  0xb5   : > { %v308_v17 = vadd.f32 1e-08, %v307_v16 }
  0xb7   : > { %1454 = vrsqrt.f32 %v308_v17 }
  0xc1   : > { %v1455_v18 = vpop.eup %1454 }
  0xc2   : > { %v310_v19 = vmul.f32 %v1455_v18, %v296_v7 }
  0xc4   : > { %322 = vperm.xlu0 %1453, %v310_v19  }
 0x143   : > { %v323_v29 = vpop.permute.xlu0 %322 }
 0x144   : > { %v325_v30 = vmul.f32 %v323_v29, %v311_v20  ;;  %v326_v31 = vmul.f32 %v323_v29, %v312_v21  ;;  %v327_v32 = vmul.f32 %v323_v29, %v313_v22  ;;  %v328_v33 = vmul.f32 %v323_v29, %v314_v23 }
 0x145   : > { %v329_v34 = vmul.f32 %v323_v29, %v315_v24  ;;  %v330_v35 = vmul.f32 %v323_v29, %v316_v25  ;;  %v331_v36 = vmul.f32 %v323_v29, %v317_v26  ;;  %v332_v37 = vmul.f32 %v323_v29, %v318_v27 }
 0x146   : > { %v333_v38 = vmul.f32 %v323_v29, %v319_v28  ;;  %334 = vst.msk [vmem:[#allocation2] sm:$0xf] %vm291_vm0, %v325_v30  ;;  %335 = vst.msk [vmem:[#allocation2 + $0x4] sm:$0xf] %vm291_vm0, %v326_v31 }
 0x147   : > { %336 = vst.msk [vmem:[#allocation2 + $0x8] sm:$0xf] %vm291_vm0, %v327_v32  ;;  %337 = vst.msk [vmem:[#allocation2 + $0xc] sm:$0xf] %vm291_vm0, %v328_v33 }
 0x148   : > { %338 = vst.msk [vmem:[#allocation2 + $0x10] sm:$0xf] %vm291_vm0, %v329_v34  ;;  %339 = vst.msk [vmem:[#allocation2 + $0x14] sm:$0xf] %vm291_vm0, %v330_v35 }
 0x149   : > { %340 = vst.msk [vmem:[#allocation2 + $0x18] sm:$0xf] %vm291_vm0, %v331_v36  ;;  %341 = vst.msk [vmem:[#allocation2 + $0x1c] sm:$0xf] %vm291_vm0, %v332_v37 }
 0x14a   : > { %342 = vst.msk [vmem:[#allocation2 + $0x20] sm:$0xf] %vm291_vm0, %v333_v38 }
 0x14b LB: >> { %vm377_vm2 = vcmask 1043456   ;;  %s349_s11 = smul.u32 24, %s1486_s10  ;;  %vm366_vm3 = vcmask 1046528   ;;  %vm372_vm4 = vcmask 31744   ;;  %vm540_vm5 = vcmask 1045504   ;;  %s1327_s13 = sshll.u32 %s1486_s10, 4  ;;  %s1486_s10 = sphi %s1593_s10, %s348_s10  }
 0x14c   : >> { %s1173_s14 = scalar_lea.vmem %s1551_s9, %s1327_s13  ;;  %vm1174_vm6 = vcmask 64512   ;;  %s348_s10 = sadd.s32 1, %s1486_s10  }
 0x14d   : >> { %v362_v40 = vld [vmem:[#allocation2 + $0x4] sm:$0xf]  ;;  %v360_v42 = vld [vmem:[#allocation2] sm:$0xf]  ;;  %s1606_s12 = scalar_lea.vmem %s1546_s6, %s349_s11  ;;  %p345_p5 = scmp.ge.s32.totalorder %s348_s10, 16  }
 0x14e   : >> { %1358 = vmatprep.subr.msk.mxu1 %vm377_vm2, %v362_v40  ;;  %v351_v43 = vld [vmem:[%s1606_s12] sm:$0xff]  ;;  %v352_v44 = vld [vmem:[%s1606_s12 + $0x8] sm:$0xff]  ;;  %v354_v45 = vld [vmem:[%s1606_s12 + $0x18] sm:$0xff] }
 0x14f   : >> { %v719_v39 = vld [vmem:[#allocation2 + $0x10] sm:$0xf]  ;;  %v811_v41 = vld [vmem:[#allocation2 + $0x14] sm:$0xf]  ;;  %1359 = vmatpush3.msk.msra.mxu1 %vm377_vm2, %v362_v40  ;;  %v367_v46 = vrot.slane %v351_v43, 1  ;;  %v368_v47 = vrot.slane %v352_v44, 1 }
 0x150   : >> { %1378 = vmatprep.subr.msk.mxu0 %vm377_vm2, %v719_v39  ;;  %1363 = vmatprep.subr.msk.mxu1 %vm377_vm2, %v360_v42  ;;  %v1612_v48 = vld [vmem:[%s1606_s12 + $0x20] sm:$0xff]  ;;  %v721_v49 = vrot.slane %v354_v45, 1  ;;  %v353_v50 = vld [vmem:[%s1606_s12 + $0x10] sm:$0x3]  ;;  %v356_v53 = vld [vmem:[%s1606_s12 + $0x28] sm:$0x3] }
 0x151   : >> { %1379 = vmatpush3.msk.msra.mxu0 %vm377_vm2, %v719_v39  ;;  %v722_v51 = vrot.slane %v1612_v48, 1  ;;  %v370_v52 = vrot.slane %v353_v50, 1  ;;  %v812_v54 = vrot.slane %v354_v45, 2  ;;  %v369_v55 = vsel %vm366_vm3, %v367_v46, %v368_v47  ;;  %v902_v62 = vld [vmem:[#allocation2 + $0x18] sm:$0xf]  ;;  %v357_v5 = vld [vmem:[%s1606_s12 + $0x30] sm:$0xff] }
 0x152   : >> { %1383 = vmatprep.subr.msk.mxu0 %vm377_vm2, %v811_v41  ;;  %v724_v56 = vrot.slane %v356_v53, 1  ;;  %v813_v57 = vrot.slane %v1612_v48, 2  ;;  %1360 = vmatprep.mubr.msk.f32.mxu1 %vm372_vm4, %v369_v55  ;;  %v539_v63 = vld [vmem:[#allocation2 + $0x8] sm:$0xf]  ;;  %v815_v0 = vrot.slane %v356_v53, 2  ;;  %v541_v1 = vrot.slane %v351_v43, 2 }
 0x153   : >> { %v723_v58 = vsel %vm366_vm3, %v721_v49, %v722_v51  ;;  %v371_v59 = vsel %vm366_vm3, %v368_v47, %v370_v52  ;;  %v542_v2 = vrot.slane %v352_v44, 2  ;;  %v990_v6 = vld [vmem:[#allocation2 + $0x1c] sm:$0xf]  ;;  %v544_v7 = vrot.slane %v353_v50, 2  ;;  %v631_v8 = vld [vmem:[#allocation2 + $0xc] sm:$0xf] }
 0x154   : >> { %1380 = vmatprep.mubr.msk.f32.mxu0 %vm372_vm4, %v723_v58  ;;  %1361 = vmatmul.mubr.msk.f32.vlgmr.msra.gmra.mrb[0].mxu1 %vm372_vm4, %v371_v59  ;;  %v725_v60 = vsel %vm366_vm3, %v722_v51, %v724_v56  ;;  %v814_v61 = vsel %vm540_vm5, %v812_v54, %v813_v57  ;;  %v816_v3 = vsel %vm540_vm5, %v813_v57, %v815_v0  ;;  %v358_v9 = vld [vmem:[%s1606_s12 + $0x38] sm:$0xff]  ;;  %v992_v10 = vrot.slane %v357_v5, 1  ;;  %v359_v13 = vld [vmem:[%s1606_s12 + $0x40] sm:$0x3] }
 0x155   : >> { %1381 = vmatmul.mubr.msk.f32.vlgmr.msra.gmra.mrb[0].mxu0 %vm372_vm4, %v725_v60  ;;  %1364 = vmatpush3.msk.msra.mxu1 %vm377_vm2, %v360_v42  ;;  %v543_v4 = vsel %vm540_vm5, %v541_v1, %v542_v2  ;;  %v993_v11 = vrot.slane %v358_v9, 1  ;;  %v545_v12 = vsel %vm540_vm5, %v542_v2, %v544_v7  ;;  %v1082_v15 = vld [vmem:[#allocation2 + $0x20] sm:$0xf]  ;;  %v995_v16 = vrot.slane %v359_v13, 1 }
 0x156   : >> { %1384 = vmatpush3.msk.msra.mxu0 %vm377_vm2, %v811_v41  ;;  %1365 = vmatprep.mubr.msk.f32.mxu1 %vm372_vm4, %v351_v43  ;;  %v1083_v17 = vrot.slane %v357_v5, 2  ;;  %v1084_v18 = vrot.slane %v358_v9, 2  ;;  %v1086_v21 = vrot.slane %v359_v13, 2 }
 0x157   : >> { %1385 = vmatprep.mubr.msk.f32.mxu0 %vm372_vm4, %v814_v61  ;;  %1388 = vmatprep.subr.msk.mxu0 %vm377_vm2, %v902_v62  ;;  %v994_v14 = vsel %vm366_vm3, %v992_v10, %v993_v11  ;;  %v996_v19 = vsel %vm366_vm3, %v993_v11, %v995_v16 }
 0x158   : >> { %1368 = vmatprep.subr.msk.mxu1 %vm377_vm2, %v539_v63  ;;  %v1085_v20 = vsel %vm540_vm5, %v1083_v17, %v1084_v18  ;;  %v1087_v22 = vsel %vm540_vm5, %v1084_v18, %v1086_v21 }
 0x15c   : >> { %1366 = vmatmul.mubr.msk.f32.vlgmr.msra.gmra.mrb[0].mxu1 %vm372_vm4, %v352_v44 }
 0x15d   : >> { %1386 = vmatmul.mubr.msk.f32.vlgmr.msra.gmra.mrb[0].mxu0 %vm372_vm4, %v816_v3  ;;  %1369 = vmatpush3.msk.msra.mxu1 %vm377_vm2, %v539_v63 }
 0x15e   : >> { %1389 = vmatpush3.msk.msra.mxu0 %vm377_vm2, %v902_v62  ;;  %1370 = vmatprep.mubr.msk.f32.mxu1 %vm372_vm4, %v543_v4 }
 0x15f   : >> { %1390 = vmatprep.mubr.msk.f32.mxu0 %vm372_vm4, %v357_v5  ;;  %1393 = vmatprep.subr.msk.mxu0 %vm377_vm2, %v990_v6 }
 0x160   : >> { %1373 = vmatprep.subr.msk.mxu1 %vm377_vm2, %v631_v8 }
 0x164   : >> { %1371 = vmatmul.mubr.msk.f32.vlgmr.msra.gmra.mrb[0].mxu1 %vm372_vm4, %v545_v12 }
 0x165   : >> { %1391 = vmatmul.mubr.msk.f32.vlgmr.msra.gmra.mrb[0].mxu0 %vm372_vm4, %v358_v9  ;;  %1374 = vmatpush3.msk.msra.mxu1 %vm377_vm2, %v631_v8 }
 0x166   : >> { %1394 = vmatpush3.msk.msra.mxu0 %vm377_vm2, %v990_v6  ;;  %1375 = vmatprep.mubr.msk.f32.mxu1 %vm372_vm4, %v354_v45 }
 0x167   : >> { %1395 = vmatprep.mubr.msk.f32.mxu0 %vm372_vm4, %v994_v14  ;;  %1398 = vmatprep.subr.msk.mxu0 %vm377_vm2, %v1082_v15 }
 0x16c   : >> { %1376 = vmatmul.mubr.msk.f32.vlgmr.msra.gmra.mrb[0].mxu1 %vm372_vm4, %v1612_v48 }
 0x16d   : >> { %1396 = vmatmul.mubr.msk.f32.vlgmr.msra.gmra.mrb[0].mxu0 %vm372_vm4, %v996_v19 }
 0x16e   : >> { %1399 = vmatpush3.msk.msra.mxu0 %vm377_vm2, %v1082_v15  ;;  %1400 = vmatprep.mubr.msk.f32.mxu0 %vm372_vm4, %v1085_v20 }
 0x175   : >> { %1401 = vmatmul.mubr.msk.f32.vlgmr.msra.gmra.mrb[0].mxu0 %vm372_vm4, %v1087_v22 }
 0x23f   : >> { %v1377_v23 = vpop.f32.mrb[0].mxu1 }
 0x240   : >> { %v707_v24 = vpop.f32.mrb[1].mxu1 }
 0x246   : > { %347 = sbr.rel (!%p345_p5) target bundleno = 331 (0x14b), region = 94 }
 0x248   : >> { %v1402_v25 = vpop.f32.mrb[0].mxu0 }
 0x249   : >> { %v1403_v26 = vadd.f32 %v1402_v25, %v1377_v23  ;;  %v1161_v27 = vpop.f32.mrb[1].mxu0 }
 0x24a   : >> { %v1404_v28 = vadd.f32 %v1161_v27, %v707_v24 }
 0x24b   : >> { %1176 = vst.msk [vmem:[%s1173_s14 + $0x8] sm:$0xff] %vm1174_vm6, %v1403_v26 }
 0x24c   : >> { %1175 = vst.msk [vmem:[%s1173_s14] sm:$0xff] %vm1174_vm6, %v1404_v28 }
 0x24d PF: > { %s15_s20 = sadd.s32 1, %s1482_s20   ;;  %s1684_s18 = smov %s1478_s19 }
 0x24e   : > { %p12_p6 = scmp.ge.s32.totalorder %s15_s20, 4   ;;  %s1685_s19 = smov %s1687_s21 }
 0x250   :  { %14 = sbr.rel (!%p12_p6) target bundleno = 2 (0x2), region = 105 }

// kernel: tpu_custom_call.1
= control target key start
LH: loop header
LB: loop body
LE: loop exit
PB: predicated region body
PF: predicated region fallthrough
CT: control target
= control target key end

     0   :  { %s1519_s18 = smov 0   ;;  %s1521_s19 = smov 0   ;;  %s1678_s0 = inlined_call_operand.vmem [shape: f32[2,1,8], index: 0, kind: input, shape index: {}]   ;;  %s1679_s1 = inlined_call_operand.vmem [shape: f32[4,8], index: 1, kind: input, shape index: {}]   ;;  %s1680_s2 = inlined_call_operand.vmem [shape: f32[4,1], index: 2, kind: input, shape index: {}]   ;;  %s1681_s3 = inlined_call_operand.vmem [shape: f32[9,4,8], index: 3, kind: input, shape index: {}]   ;;  %s1682_s4 = inlined_call_operand.vmem [shape: f32[2,1,18,18,4], index: 4, kind: input, shape index: {}]   ;;  %s1683_s5 = inlined_call_operand.vmem [shape: f32[2,16,16,8], index: 5, kind: output, shape index: {}]  }
   0x1   :  { %s1523_s20 = smov 0  }
   0x2 LB: > { %s27_s21 = sadd.s32 1, %s1478_s19  ;;  %p1295_p0 = scmp.ge.s32.totalorder %s1482_s20, 1  ;;  %s1482_s20 = sphi %s1523_s20, %s15_s20   ;;  %s1478_s19 = sphi %s1521_s19, %s1685_s19   ;;  %s1474_s18 = sphi %s1519_s18, %s1684_s18  }
   0x3   : > { %p29_p1 = scmp.ge.s32.totalorder %s27_s21, 2  ;;  %p215_p2 = scmp.lt.s32.totalorder %s1482_s20, 3 }
   0x5   : > { %s1687_s21 = smov (%p29_p1, %s27_s21), 0  ;;  %p216_p3 = pnand %p1295_p0, %p215_p2 }
   0x6   : > { %p255_p4 = scmp.lt.s32.totalorder (!%p216_p3), %s1474_s18, 1  ;;  %v282_v0 = vld [vmem:[%s1679_s1] sm:$0xf] (!%p216_p3)  ;;  %vm291_vm0 = vcmask (!%p216_p3), 60416   ;;  %v1488_v4 = vmov (!%p216_p3), 0   ;;  %vm298_vm1 = vcmask (!%p216_p3), 3072  }
   0x7   : > { %219 = sbr.rel (%p216_p3) target bundleno = 589 (0x24d), region = 40  ;;  %1453 = vset.pattern.permute.xlu0 (!%p216_p3), %v1488_v4  ;;  %v295_v5 = vld [vmem:[%s1680_s2] sm:$0xf] (!%p216_p3)  ;;  %v312_v21 = vld [vmem:[%s1681_s3 + $0x4] sm:$0xf] (!%p216_p3)  ;;  %s1593_s10 = smov (!%p216_p3), 0  }
   0x8   : > { %v311_v20 = vld [vmem:[%s1681_s3] sm:$0xf] (!%p216_p3)  ;;  %v313_v22 = vld [vmem:[%s1681_s3 + $0x8] sm:$0xf] (!%p216_p3)  ;;  %v314_v23 = vld [vmem:[%s1681_s3 + $0xc] sm:$0xf] (!%p216_p3) }
   0x9   : > { %v315_v24 = vld [vmem:[%s1681_s3 + $0x10] sm:$0xf] (!%p216_p3)  ;;  %v316_v25 = vld [vmem:[%s1681_s3 + $0x14] sm:$0xf] (!%p216_p3)  ;;  %v317_v26 = vld [vmem:[%s1681_s3 + $0x18] sm:$0xf] (!%p216_p3) }
   0xa   : > { %v318_v27 = vld [vmem:[%s1681_s3 + $0x1c] sm:$0xf] (!%p216_p3)  ;;  %v319_v28 = vld [vmem:[%s1681_s3 + $0x20] sm:$0xf] (!%p216_p3) }
   0xe   : > { %s1689_s18 = smov (!%p255_p4, %s1474_s18), 1 }
   0xf   : > { %s257_s26 = scalar_lea.vmem %s1678_s0, %s1689_s18  ;;  %s1419_s27 = smul.u32 432, %s1689_s18 }
  0x10   : > { %s1330_s28 = sshll.u32 %s1689_s18, 8  ;;  %v1299_v1 = vld [vmem:[%s257_s26] ss:$0 sm:$0xff] }
  0x11   : > { %s1546_s6 = scalar_lea.vmem %s1682_s4, %s1419_s27  ;;  %s1551_s9 = scalar_lea.vmem %s1683_s5, %s1330_s28  ;;  %v290_v2 = vmul.f32 %v1299_v1, %v282_v0 }
  0x13   : > { %v292_v3 = vsel %vm291_vm0, %v290_v2, 0.0 }
  0x14   : > { %293 = vadd.xlane.f32.xlu0 %v292_v3 }
  0xa1   : > { %v294_v6 = vpop.xlane.xlu0 %293 }
  0xa2   : > { %v296_v7 = vadd.f32 %v295_v5, %v294_v6 }
  0xa4   : > { %v297_v8 = vmul.f32 %v296_v7, %v296_v7 }
  0xa6   : > { %v299_v9 = vsel %vm298_vm1, %v297_v8, 0.0 }
  0xa7   : > { %v300_v10 = vrot.slane %v299_v9, 4 }
  0xa9   : > { %v301_v11 = vadd.f32 %v300_v10, %v299_v9 }
  0xab   : > { %v302_v12 = vrot.slane %v301_v11, 2 }
  0xad   : > { %v303_v13 = vadd.f32 %v302_v12, %v301_v11 }
  0xaf   : > { %v304_v14 = vrot.slane %v303_v13, 1 }
  0xb1   : > { %v305_v15 = vadd.f32 %v304_v14, %v303_v13 }
  0xb3   : > { %v307_v16 = vmul.f32 0.25, %v305_v15 }
  0xb5   : > { %v308_v17 = vadd.f32 1e-08, %v307_v16 }
  0xb7   : > { %1454 = vrsqrt.f32 %v308_v17 }
  0xc1   : > { %v1455_v18 = vpop.eup %1454 }
  0xc2   : > { %v310_v19 = vmul.f32 %v1455_v18, %v296_v7 }
  0xc4   : > { %322 = vperm.xlu0 %1453, %v310_v19  }
 0x143   : > { %v323_v29 = vpop.permute.xlu0 %322 }
 0x144   : > { %v325_v30 = vmul.f32 %v323_v29, %v311_v20  ;;  %v326_v31 = vmul.f32 %v323_v29, %v312_v21  ;;  %v327_v32 = vmul.f32 %v323_v29, %v313_v22  ;;  %v328_v33 = vmul.f32 %v323_v29, %v314_v23 }
 0x145   : > { %v329_v34 = vmul.f32 %v323_v29, %v315_v24  ;;  %v330_v35 = vmul.f32 %v323_v29, %v316_v25  ;;  %v331_v36 = vmul.f32 %v323_v29, %v317_v26  ;;  %v332_v37 = vmul.f32 %v323_v29, %v318_v27 }
 0x146   : > { %v333_v38 = vmul.f32 %v323_v29, %v319_v28  ;;  %334 = vst.msk [vmem:[#allocation2] sm:$0xf] %vm291_vm0, %v325_v30  ;;  %335 = vst.msk [vmem:[#allocation2 + $0x4] sm:$0xf] %vm291_vm0, %v326_v31 }
 0x147   : > { %336 = vst.msk [vmem:[#allocation2 + $0x8] sm:$0xf] %vm291_vm0, %v327_v32  ;;  %337 = vst.msk [vmem:[#allocation2 + $0xc] sm:$0xf] %vm291_vm0, %v328_v33 }
 0x148   : > { %338 = vst.msk [vmem:[#allocation2 + $0x10] sm:$0xf] %vm291_vm0, %v329_v34  ;;  %339 = vst.msk [vmem:[#allocation2 + $0x14] sm:$0xf] %vm291_vm0, %v330_v35 }
 0x149   : > { %340 = vst.msk [vmem:[#allocation2 + $0x18] sm:$0xf] %vm291_vm0, %v331_v36  ;;  %341 = vst.msk [vmem:[#allocation2 + $0x1c] sm:$0xf] %vm291_vm0, %v332_v37 }
 0x14a   : > { %342 = vst.msk [vmem:[#allocation2 + $0x20] sm:$0xf] %vm291_vm0, %v333_v38 }
 0x14b LB: >> { %vm377_vm2 = vcmask 1043456   ;;  %s349_s11 = smul.u32 24, %s1486_s10  ;;  %vm366_vm3 = vcmask 1046528   ;;  %vm372_vm4 = vcmask 31744   ;;  %vm540_vm5 = vcmask 1045504   ;;  %s1327_s13 = sshll.u32 %s1486_s10, 4  ;;  %s1486_s10 = sphi %s1593_s10, %s348_s10  }
 0x14c   : >> { %s1173_s14 = scalar_lea.vmem %s1551_s9, %s1327_s13  ;;  %vm1174_vm6 = vcmask 64512   ;;  %s348_s10 = sadd.s32 1, %s1486_s10  }
 0x14d   : >> { %v362_v40 = vld [vmem:[#allocation2 + $0x4] sm:$0xf]  ;;  %v360_v42 = vld [vmem:[#allocation2] sm:$0xf]  ;;  %s1606_s12 = scalar_lea.vmem %s1546_s6, %s349_s11  ;;  %p345_p5 = scmp.ge.s32.totalorder %s348_s10, 16  }
 0x14e   : >> { %1358 = vmatprep.subr.msk.mxu1 %vm377_vm2, %v362_v40  ;;  %v351_v43 = vld [vmem:[%s1606_s12] sm:$0xff]  ;;  %v352_v44 = vld [vmem:[%s1606_s12 + $0x8] sm:$0xff]  ;;  %v354_v45 = vld [vmem:[%s1606_s12 + $0x18] sm:$0xff] }
 0x14f   : >> { %v719_v39 = vld [vmem:[#allocation2 + $0x10] sm:$0xf]  ;;  %v811_v41 = vld [vmem:[#allocation2 + $0x14] sm:$0xf]  ;;  %1359 = vmatpush3.msk.msra.mxu1 %vm377_vm2, %v362_v40  ;;  %v367_v46 = vrot.slane %v351_v43, 1  ;;  %v368_v47 = vrot.slane %v352_v44, 1 }
 0x150   : >> { %1378 = vmatprep.subr.msk.mxu0 %vm377_vm2, %v719_v39  ;;  %1363 = vmatprep.subr.msk.mxu1 %vm377_vm2, %v360_v42  ;;  %v1612_v48 = vld [vmem:[%s1606_s12 + $0x20] sm:$0xff]  ;;  %v721_v49 = vrot.slane %v354_v45, 1  ;;  %v353_v50 = vld [vmem:[%s1606_s12 + $0x10] sm:$0x3]  ;;  %v356_v53 = vld [vmem:[%s1606_s12 + $0x28] sm:$0x3] }
 0x151   : >> { %1379 = vmatpush3.msk.msra.mxu0 %vm377_vm2, %v719_v39  ;;  %v722_v51 = vrot.slane %v1612_v48, 1  ;;  %v370_v52 = vrot.slane %v353_v50, 1  ;;  %v812_v54 = vrot.slane %v354_v45, 2  ;;  %v369_v55 = vsel %vm366_vm3, %v367_v46, %v368_v47  ;;  %v902_v62 = vld [vmem:[#allocation2 + $0x18] sm:$0xf]  ;;  %v357_v5 = vld [vmem:[%s1606_s12 + $0x30] sm:$0xff] }
 0x152   : >> { %1383 = vmatprep.subr.msk.mxu0 %vm377_vm2, %v811_v41  ;;  %v724_v56 = vrot.slane %v356_v53, 1  ;;  %v813_v57 = vrot.slane %v1612_v48, 2  ;;  %1360 = vmatprep.mubr.msk.f32.mxu1 %vm372_vm4, %v369_v55  ;;  %v539_v63 = vld [vmem:[#allocation2 + $0x8] sm:$0xf]  ;;  %v815_v0 = vrot.slane %v356_v53, 2  ;;  %v541_v1 = vrot.slane %v351_v43, 2 }
 0x153   : >> { %v723_v58 = vsel %vm366_vm3, %v721_v49, %v722_v51  ;;  %v371_v59 = vsel %vm366_vm3, %v368_v47, %v370_v52  ;;  %v542_v2 = vrot.slane %v352_v44, 2  ;;  %v990_v6 = vld [vmem:[#allocation2 + $0x1c] sm:$0xf]  ;;  %v544_v7 = vrot.slane %v353_v50, 2  ;;  %v631_v8 = vld [vmem:[#allocation2 + $0xc] sm:$0xf] }
 0x154   : >> { %1380 = vmatprep.mubr.msk.f32.mxu0 %vm372_vm4, %v723_v58  ;;  %1361 = vmatmul.mubr.msk.f32.vlgmr.msra.gmra.mrb[0].mxu1 %vm372_vm4, %v371_v59  ;;  %v725_v60 = vsel %vm366_vm3, %v722_v51, %v724_v56  ;;  %v814_v61 = vsel %vm540_vm5, %v812_v54, %v813_v57  ;;  %v816_v3 = vsel %vm540_vm5, %v813_v57, %v815_v0  ;;  %v358_v9 = vld [vmem:[%s1606_s12 + $0x38] sm:$0xff]  ;;  %v992_v10 = vrot.slane %v357_v5, 1  ;;  %v359_v13 = vld [vmem:[%s1606_s12 + $0x40] sm:$0x3] }
 0x155   : >> { %1381 = vmatmul.mubr.msk.f32.vlgmr.msra.gmra.mrb[0].mxu0 %vm372_vm4, %v725_v60  ;;  %1364 = vmatpush3.msk.msra.mxu1 %vm377_vm2, %v360_v42  ;;  %v543_v4 = vsel %vm540_vm5, %v541_v1, %v542_v2  ;;  %v993_v11 = vrot.slane %v358_v9, 1  ;;  %v545_v12 = vsel %vm540_vm5, %v542_v2, %v544_v7  ;;  %v1082_v15 = vld [vmem:[#allocation2 + $0x20] sm:$0xf]  ;;  %v995_v16 = vrot.slane %v359_v13, 1 }
 0x156   : >> { %1384 = vmatpush3.msk.msra.mxu0 %vm377_vm2, %v811_v41  ;;  %1365 = vmatprep.mubr.msk.f32.mxu1 %vm372_vm4, %v351_v43  ;;  %v1083_v17 = vrot.slane %v357_v5, 2  ;;  %v1084_v18 = vrot.slane %v358_v9, 2  ;;  %v1086_v21 = vrot.slane %v359_v13, 2 }
 0x157   : >> { %1385 = vmatprep.mubr.msk.f32.mxu0 %vm372_vm4, %v814_v61  ;;  %1388 = vmatprep.subr.msk.mxu0 %vm377_vm2, %v902_v62  ;;  %v994_v14 = vsel %vm366_vm3, %v992_v10, %v993_v11  ;;  %v996_v19 = vsel %vm366_vm3, %v993_v11, %v995_v16 }
 0x158   : >> { %1368 = vmatprep.subr.msk.mxu1 %vm377_vm2, %v539_v63  ;;  %v1085_v20 = vsel %vm540_vm5, %v1083_v17, %v1084_v18  ;;  %v1087_v22 = vsel %vm540_vm5, %v1084_v18, %v1086_v21 }
 0x15c   : >> { %1366 = vmatmul.mubr.msk.f32.vlgmr.msra.gmra.mrb[0].mxu1 %vm372_vm4, %v352_v44 }
 0x15d   : >> { %1386 = vmatmul.mubr.msk.f32.vlgmr.msra.gmra.mrb[0].mxu0 %vm372_vm4, %v816_v3  ;;  %1369 = vmatpush3.msk.msra.mxu1 %vm377_vm2, %v539_v63 }
 0x15e   : >> { %1389 = vmatpush3.msk.msra.mxu0 %vm377_vm2, %v902_v62  ;;  %1370 = vmatprep.mubr.msk.f32.mxu1 %vm372_vm4, %v543_v4 }
 0x15f   : >> { %1390 = vmatprep.mubr.msk.f32.mxu0 %vm372_vm4, %v357_v5  ;;  %1393 = vmatprep.subr.msk.mxu0 %vm377_vm2, %v990_v6 }
 0x160   : >> { %1373 = vmatprep.subr.msk.mxu1 %vm377_vm2, %v631_v8 }
 0x164   : >> { %1371 = vmatmul.mubr.msk.f32.vlgmr.msra.gmra.mrb[0].mxu1 %vm372_vm4, %v545_v12 }
 0x165   : >> { %1391 = vmatmul.mubr.msk.f32.vlgmr.msra.gmra.mrb[0].mxu0 %vm372_vm4, %v358_v9  ;;  %1374 = vmatpush3.msk.msra.mxu1 %vm377_vm2, %v631_v8 }
 0x166   : >> { %1394 = vmatpush3.msk.msra.mxu0 %vm377_vm2, %v990_v6  ;;  %1375 = vmatprep.mubr.msk.f32.mxu1 %vm372_vm4, %v354_v45 }
 0x167   : >> { %1395 = vmatprep.mubr.msk.f32.mxu0 %vm372_vm4, %v994_v14  ;;  %1398 = vmatprep.subr.msk.mxu0 %vm377_vm2, %v1082_v15 }
 0x16c   : >> { %1376 = vmatmul.mubr.msk.f32.vlgmr.msra.gmra.mrb[0].mxu1 %vm372_vm4, %v1612_v48 }
 0x16d   : >> { %1396 = vmatmul.mubr.msk.f32.vlgmr.msra.gmra.mrb[0].mxu0 %vm372_vm4, %v996_v19 }
 0x16e   : >> { %1399 = vmatpush3.msk.msra.mxu0 %vm377_vm2, %v1082_v15  ;;  %1400 = vmatprep.mubr.msk.f32.mxu0 %vm372_vm4, %v1085_v20 }
 0x175   : >> { %1401 = vmatmul.mubr.msk.f32.vlgmr.msra.gmra.mrb[0].mxu0 %vm372_vm4, %v1087_v22 }
 0x23f   : >> { %v1377_v23 = vpop.f32.mrb[0].mxu1 }
 0x240   : >> { %v707_v24 = vpop.f32.mrb[1].mxu1 }
 0x246   : > { %347 = sbr.rel (!%p345_p5) target bundleno = 331 (0x14b), region = 94 }
 0x248   : >> { %v1402_v25 = vpop.f32.mrb[0].mxu0 }
 0x249   : >> { %v1403_v26 = vadd.f32 %v1402_v25, %v1377_v23  ;;  %v1161_v27 = vpop.f32.mrb[1].mxu0 }
 0x24a   : >> { %v1404_v28 = vadd.f32 %v1161_v27, %v707_v24 }
 0x24b   : >> { %1176 = vst.msk [vmem:[%s1173_s14 + $0x8] sm:$0xff] %vm1174_vm6, %v1403_v26 }
 0x24c   : >> { %1175 = vst.msk [vmem:[%s1173_s14] sm:$0xff] %vm1174_vm6, %v1404_v28 }
 0x24d PF: > { %s15_s20 = sadd.s32 1, %s1482_s20   ;;  %s1684_s18 = smov %s1478_s19 }
 0x24e   : > { %p12_p6 = scmp.ge.s32.totalorder %s15_s20, 4   ;;  %s1685_s19 = smov %s1687_s21 }
 0x250   :  { %14 = sbr.rel (!%p12_p6) target bundleno = 2 (0x2), region = 105 }

</bundles_post_ra>
